<compile_context>
chip_gen: v7x
topology: tpu7x:2x2x1
jax: 0.10.0
libtpu: 0.0.40
codegen_flags: <defaults>
</compile_context>

<pallas_src>
import jax
import jax.numpy as jnp
from jax.experimental import pallas as pl
from jax.experimental.pallas import tpu as pltpu

INPUT_DIM = 6
COND_DIM = 300
COND_OUT_DIM = 6
OUTPUT_DIM = 5
HIDDEN = 64
BN_EPS = 1e-5


def atcnn_kernel(ipt_ref, cond_ref, w1_ref, gb1_ref, w2_ref, gb2_ref, wc_ref,
                 out_ref):
    # ---- condition layer 1: Linear(300,64) [bias folded out by BN] + BN + ReLU
    h = jnp.dot(cond_ref[...], w1_ref[...], preferred_element_type=jnp.float32)
    mu1 = jnp.mean(h, axis=0, keepdims=True)
    var1 = jnp.mean(h * h, axis=0, keepdims=True) - mu1 * mu1
    scale1 = gb1_ref[0:1, :] * jax.lax.rsqrt(var1 + BN_EPS)
    shift1 = gb1_ref[1:2, :] - mu1 * scale1
    h = jnp.maximum(h * scale1 + shift1, 0.0)

    # ---- condition layer 2: Linear(64,6) [bias folded out by BN] + BN + ReLU
    c = jnp.dot(h, w2_ref[...], preferred_element_type=jnp.float32)
    mu2 = jnp.mean(c, axis=0, keepdims=True)
    var2 = jnp.mean(c * c, axis=0, keepdims=True) - mu2 * mu2
    scale2 = gb2_ref[0:1, :] * jax.lax.rsqrt(var2 + BN_EPS)
    shift2 = gb2_ref[1:2, :] - mu2 * scale2
    c = jnp.maximum(c * scale2 + shift2, 0.0)

    # ---- combiner (target Linear pre-folded):
    #   logits = ipt @ (wci @ wt).T + c @ wcc.T
    # wc_ref is the stacked, pre-transposed weight: rows [0:6]=(wci@wt).T,
    # rows [6:12]=wcc.T  (static ref slices, zero runtime cost).
    logits = (jnp.dot(ipt_ref[...], wc_ref[0:INPUT_DIM, :],
                      preferred_element_type=jnp.float32)
              + jnp.dot(c, wc_ref[INPUT_DIM:, :],
                        preferred_element_type=jnp.float32))

    # ---- Softmax(dim=1)  (exact division kept: denominator is tiny, and
    # approx vrcp would cost ~2e-4 rel error against the reference tolerance)
    m = jnp.max(logits, axis=1, keepdims=True)
    e = jnp.exp(logits - m)
    out_ref[...] = e / jnp.sum(e, axis=1, keepdims=True)


def _full_spec(shape):
    # single grid point; every operand is one full-extent block resident in VMEM
    nd = len(shape)
    return pl.BlockSpec(shape, lambda i, _nd=nd: (0,) * _nd)


def atcnn_forward(ipt, cond, params):
    B = ipt.shape[0]
    (wt, w1, b1, g1, be1, w2, b2, g2, be2, wc) = params
    del b1, b2  # exactly canceled by training-mode BN mean subtraction

    # one-time wrapper-side algebraic folds / layout plumbing (weights only;
    # no per-sample compute is hoisted out of the kernel)
    wci = wc[:, :INPUT_DIM]                      # (OUT, IN)   -> ipt path
    wcc = wc[:, INPUT_DIM:]                      # (OUT, COND) -> cond path
    w_eff_t = (wci @ wt).T                       # (IN, OUT)  target folded in
    wcomb = jnp.concatenate([w_eff_t, wcc.T], axis=0)   # (IN+COND_OUT, OUT)
    w1t = w1.T                                   # (COND_DIM, HIDDEN)
    w2t = w2.T                                   # (HIDDEN, COND_OUT)
    gb1 = jnp.stack([g1, be1], axis=0)           # (2, HIDDEN)
    gb2 = jnp.stack([g2, be2], axis=0)           # (2, COND_OUT)

    operands = (ipt, cond, w1t, gb1, w2t, gb2, wcomb)

    # TODO(synk): for very large B (esp. v7x 64 MiB VMEM), tile the batch axis
    # with grid=(pl.cdiv(B, TB),) marked "parallel"; training-mode BN batch
    # statistics would then need a two-pass / scratch accumulation scheme.
    return pl.pallas_call(
        atcnn_kernel,
        out_shape=jax.ShapeDtypeStruct((B, OUTPUT_DIM), jnp.float32),
        grid=(1,),
        in_specs=[_full_spec(op.shape) for op in operands],
        out_specs=_full_spec((B, OUTPUT_DIM)),
        compiler_params=pltpu.CompilerParams(
            dimension_semantics=("arbitrary",)),
    )(*operands)


def init_params(key):
    ks = jax.random.split(key, 6)
    scale = 0.1
    wt = scale * jax.random.normal(ks[0], (INPUT_DIM, INPUT_DIM), jnp.float32)
    w1 = scale * jax.random.normal(ks[1], (HIDDEN, COND_DIM), jnp.float32)
    b1 = scale * jax.random.normal(ks[2], (HIDDEN,), jnp.float32)
    g1 = jnp.ones((HIDDEN,), jnp.float32)
    be1 = jnp.zeros((HIDDEN,), jnp.float32)
    w2 = scale * jax.random.normal(ks[3], (COND_OUT_DIM, HIDDEN), jnp.float32)
    b2 = scale * jax.random.normal(ks[4], (COND_OUT_DIM,), jnp.float32)
    g2 = jnp.ones((COND_OUT_DIM,), jnp.float32)
    be2 = jnp.zeros((COND_OUT_DIM,), jnp.float32)
    wc = scale * jax.random.normal(ks[5], (OUTPUT_DIM, COND_OUT_DIM + INPUT_DIM),
                                   jnp.float32)
    return (wt, w1, b1, g1, be1, w2, b2, g2, be2, wc)


def reference_forward(ipt, cond, params):
    # PyTorch-faithful reference (biases included, two-pass BN statistics).
    (wt, w1, b1, g1, be1, w2, b2, g2, be2, wc) = params
    t = ipt @ wt.T
    h = cond @ w1.T + b1
    mu1 = h.mean(0, keepdims=True)
    var1 = ((h - mu1) ** 2).mean(0, keepdims=True)
    h = jnp.maximum((h - mu1) / jnp.sqrt(var1 + BN_EPS) * g1 + be1, 0.0)
    c = h @ w2.T + b2
    mu2 = c.mean(0, keepdims=True)
    var2 = ((c - mu2) ** 2).mean(0, keepdims=True)
    c = jnp.maximum((c - mu2) / jnp.sqrt(var2 + BN_EPS) * g2 + be2, 0.0)
    x = jnp.concatenate([t, c], axis=1)
    logits = x @ wc.T
    return jax.nn.softmax(logits, axis=1)


if __name__ == "__main__":
    key = jax.random.PRNGKey(0)
    k_ipt, k_cond, k_par = jax.random.split(key, 3)

    B = 8  # small batch (>1 required for training-mode BatchNorm, as in PyTorch)
    ipt = jax.random.normal(k_ipt, (B, INPUT_DIM), jnp.float32)
    cond = jax.random.normal(k_cond, (B, COND_DIM), jnp.float32)
    params = init_params(k_par)

    out = atcnn_forward(ipt, cond, params)
    out = jax.block_until_ready(out)

    ref = reference_forward(ipt, cond, params)
    assert out.shape == (B, OUTPUT_DIM)
    assert jnp.allclose(out, ref, atol=1e-5, rtol=1e-4), "mismatch vs reference"
    assert jnp.allclose(out.sum(axis=1), 1.0, atol=1e-5), "softmax rows must sum to 1"

    print("KERNEL_OK")
</pallas_src>

<mosaic_0001>
module attributes {stable_mosaic.version = 11 : i64} {
  func.func @atcnn_kernel(%arg0: i32, %arg1: memref<8x6xf32, #tpu.memory_space<vmem>>, %arg2: memref<8x300xf32, #tpu.memory_space<vmem>>, %arg3: memref<300x64xf32, #tpu.memory_space<vmem>>, %arg4: memref<2x64xf32, #tpu.memory_space<vmem>>, %arg5: memref<64x6xf32, #tpu.memory_space<vmem>>, %arg6: memref<2x6xf32, #tpu.memory_space<vmem>>, %arg7: memref<12x5xf32, #tpu.memory_space<vmem>>, %arg8: memref<8x5xf32, #tpu.memory_space<vmem>>) attributes {dimension_semantics = [#tpu.dimension_semantics<arbitrary>], iteration_bounds = array<i64: 1>, scalar_prefetch = 0 : i64, scratch_operands = 0 : i64, tpu.core_type = #tpu.core_type<tc>, window_params = [{pipeline_mode = #tpu.pipeline_mode<synchronous>, transform_indices = @transform_0, window_bounds = array<i64: 8, 6>}, {pipeline_mode = #tpu.pipeline_mode<synchronous>, transform_indices = @transform_1, window_bounds = array<i64: 8, 300>}, {pipeline_mode = #tpu.pipeline_mode<synchronous>, transform_indices = @transform_2, window_bounds = array<i64: 300, 64>}, {pipeline_mode = #tpu.pipeline_mode<synchronous>, transform_indices = @transform_3, window_bounds = array<i64: 2, 64>}, {pipeline_mode = #tpu.pipeline_mode<synchronous>, transform_indices = @transform_4, window_bounds = array<i64: 64, 6>}, {pipeline_mode = #tpu.pipeline_mode<synchronous>, transform_indices = @transform_5, window_bounds = array<i64: 2, 6>}, {pipeline_mode = #tpu.pipeline_mode<synchronous>, transform_indices = @transform_6, window_bounds = array<i64: 12, 5>}, {pipeline_mode = #tpu.pipeline_mode<synchronous>, transform_indices = @transform_7, window_bounds = array<i64: 8, 5>}]} {
    %c0 = arith.constant 0 : index
    %c0_0 = arith.constant 0 : index
    %0 = vector.load %arg2[%c0, %c0_0] : memref<8x300xf32, #tpu.memory_space<vmem>>, vector<8x300xf32>
    %c0_1 = arith.constant 0 : index
    %c0_2 = arith.constant 0 : index
    %1 = vector.load %arg3[%c0_1, %c0_2] : memref<300x64xf32, #tpu.memory_space<vmem>>, vector<300x64xf32>
    %cst = arith.constant dense<0.000000e+00> : vector<8x64xf32>
    %2 = tpu.matmul %0, %1, %cst {dimension_numbers = #tpu.dot_dimension_numbers<[1], [0], [0], [1], [0, 0, 1, 1], [], []>} : vector<8x300xf32>, vector<300x64xf32>, vector<8x64xf32> -> vector<8x64xf32>
    %cst_3 = arith.constant dense<0.000000e+00> : vector<64xf32>
    %3 = vector.multi_reduction <add>, %2, %cst_3 [0] : vector<8x64xf32> to vector<64xf32>
    %4 = vector.shape_cast %3 : vector<64xf32> to vector<1x64xf32>
    %cst_4 = arith.constant 8.000000e+00 : f32
    %5 = vector.broadcast %cst_4 : f32 to vector<1x64xf32>
    %6 = arith.divf %4, %5 : vector<1x64xf32>
    %7 = arith.mulf %2, %2 : vector<8x64xf32>
    %cst_5 = arith.constant dense<0.000000e+00> : vector<64xf32>
    %8 = vector.multi_reduction <add>, %7, %cst_5 [0] : vector<8x64xf32> to vector<64xf32>
    %9 = vector.shape_cast %8 : vector<64xf32> to vector<1x64xf32>
    %cst_6 = arith.constant 8.000000e+00 : f32
    %10 = vector.broadcast %cst_6 : f32 to vector<1x64xf32>
    %11 = arith.divf %9, %10 : vector<1x64xf32>
    %12 = arith.mulf %6, %6 : vector<1x64xf32>
    %13 = arith.subf %11, %12 : vector<1x64xf32>
    %c0_7 = arith.constant 0 : index
    %c0_8 = arith.constant 0 : index
    %14 = vector.load %arg4[%c0_7, %c0_8] : memref<2x64xf32, #tpu.memory_space<vmem>>, vector<1x64xf32>
    %cst_9 = arith.constant 9.99999974E-6 : f32
    %15 = vector.broadcast %cst_9 : f32 to vector<1x64xf32>
    %16 = arith.addf %13, %15 : vector<1x64xf32>
    %17 = math.rsqrt %16 : vector<1x64xf32>
    %18 = arith.mulf %14, %17 : vector<1x64xf32>
    %c1 = arith.constant 1 : index
    %c0_10 = arith.constant 0 : index
    %19 = vector.load %arg4[%c1, %c0_10] : memref<2x64xf32, #tpu.memory_space<vmem>>, vector<1x64xf32>
    %20 = arith.mulf %6, %18 : vector<1x64xf32>
    %21 = arith.subf %19, %20 : vector<1x64xf32>
    %22 = vector.broadcast %18 : vector<1x64xf32> to vector<8x64xf32>
    %23 = arith.mulf %2, %22 : vector<8x64xf32>
    %24 = vector.broadcast %21 : vector<1x64xf32> to vector<8x64xf32>
    %25 = arith.addf %23, %24 : vector<8x64xf32>
    %cst_11 = arith.constant 0.000000e+00 : f32
    %26 = vector.broadcast %cst_11 : f32 to vector<8x64xf32>
    %27 = arith.maximumf %25, %26 : vector<8x64xf32>
    %c0_12 = arith.constant 0 : index
    %c0_13 = arith.constant 0 : index
    %28 = vector.load %arg5[%c0_12, %c0_13] : memref<64x6xf32, #tpu.memory_space<vmem>>, vector<64x6xf32>
    %cst_14 = arith.constant dense<0.000000e+00> : vector<8x6xf32>
    %29 = tpu.matmul %27, %28, %cst_14 {dimension_numbers = #tpu.dot_dimension_numbers<[1], [0], [0], [1], [0, 0, 1, 1], [], []>} : vector<8x64xf32>, vector<64x6xf32>, vector<8x6xf32> -> vector<8x6xf32>
    %cst_15 = arith.constant dense<0.000000e+00> : vector<6xf32>
    %30 = vector.multi_reduction <add>, %29, %cst_15 [0] : vector<8x6xf32> to vector<6xf32>
    %31 = vector.shape_cast %30 : vector<6xf32> to vector<1x6xf32>
    %cst_16 = arith.constant 8.000000e+00 : f32
    %32 = vector.broadcast %cst_16 : f32 to vector<1x6xf32>
    %33 = arith.divf %31, %32 : vector<1x6xf32>
    %34 = arith.mulf %29, %29 : vector<8x6xf32>
    %cst_17 = arith.constant dense<0.000000e+00> : vector<6xf32>
    %35 = vector.multi_reduction <add>, %34, %cst_17 [0] : vector<8x6xf32> to vector<6xf32>
    %36 = vector.shape_cast %35 : vector<6xf32> to vector<1x6xf32>
    %cst_18 = arith.constant 8.000000e+00 : f32
    %37 = vector.broadcast %cst_18 : f32 to vector<1x6xf32>
    %38 = arith.divf %36, %37 : vector<1x6xf32>
    %39 = arith.mulf %33, %33 : vector<1x6xf32>
    %40 = arith.subf %38, %39 : vector<1x6xf32>
    %c0_19 = arith.constant 0 : index
    %c0_20 = arith.constant 0 : index
    %41 = vector.load %arg6[%c0_19, %c0_20] : memref<2x6xf32, #tpu.memory_space<vmem>>, vector<1x6xf32>
    %cst_21 = arith.constant 9.99999974E-6 : f32
    %42 = vector.broadcast %cst_21 : f32 to vector<1x6xf32>
    %43 = arith.addf %40, %42 : vector<1x6xf32>
    %44 = math.rsqrt %43 : vector<1x6xf32>
    %45 = arith.mulf %41, %44 : vector<1x6xf32>
    %c1_22 = arith.constant 1 : index
    %c0_23 = arith.constant 0 : index
    %46 = vector.load %arg6[%c1_22, %c0_23] : memref<2x6xf32, #tpu.memory_space<vmem>>, vector<1x6xf32>
    %47 = arith.mulf %33, %45 : vector<1x6xf32>
    %48 = arith.subf %46, %47 : vector<1x6xf32>
    %49 = vector.broadcast %45 : vector<1x6xf32> to vector<8x6xf32>
    %50 = arith.mulf %29, %49 : vector<8x6xf32>
    %51 = vector.broadcast %48 : vector<1x6xf32> to vector<8x6xf32>
    %52 = arith.addf %50, %51 : vector<8x6xf32>
    %cst_24 = arith.constant 0.000000e+00 : f32
    %53 = vector.broadcast %cst_24 : f32 to vector<8x6xf32>
    %54 = arith.maximumf %52, %53 : vector<8x6xf32>
    %c0_25 = arith.constant 0 : index
    %c0_26 = arith.constant 0 : index
    %55 = vector.load %arg1[%c0_25, %c0_26] : memref<8x6xf32, #tpu.memory_space<vmem>>, vector<8x6xf32>
    %c0_27 = arith.constant 0 : index
    %c0_28 = arith.constant 0 : index
    %56 = vector.load %arg7[%c0_27, %c0_28] : memref<12x5xf32, #tpu.memory_space<vmem>>, vector<6x5xf32>
    %cst_29 = arith.constant dense<0.000000e+00> : vector<8x5xf32>
    %57 = tpu.matmul %55, %56, %cst_29 {dimension_numbers = #tpu.dot_dimension_numbers<[1], [0], [0], [1], [0, 0, 1, 1], [], []>} : vector<8x6xf32>, vector<6x5xf32>, vector<8x5xf32> -> vector<8x5xf32>
    %c6 = arith.constant 6 : index
    %c0_30 = arith.constant 0 : index
    %58 = vector.load %arg7[%c6, %c0_30] : memref<12x5xf32, #tpu.memory_space<vmem>>, vector<6x5xf32>
    %cst_31 = arith.constant dense<0.000000e+00> : vector<8x5xf32>
    %59 = tpu.matmul %54, %58, %cst_31 {dimension_numbers = #tpu.dot_dimension_numbers<[1], [0], [0], [1], [0, 0, 1, 1], [], []>} : vector<8x6xf32>, vector<6x5xf32>, vector<8x5xf32> -> vector<8x5xf32>
    %60 = arith.addf %57, %59 : vector<8x5xf32>
    %cst_32 = arith.constant dense<0xFF800000> : vector<8xf32>
    %61 = vector.multi_reduction <maximumf>, %60, %cst_32 [1] : vector<8x5xf32> to vector<8xf32>
    %62 = vector.shape_cast %61 : vector<8xf32> to vector<8x1xf32>
    %63 = vector.broadcast %62 : vector<8x1xf32> to vector<8x5xf32>
    %64 = arith.subf %60, %63 : vector<8x5xf32>
    %65 = math.exp %64 : vector<8x5xf32>
    %cst_33 = arith.constant dense<0.000000e+00> : vector<8xf32>
    %66 = vector.multi_reduction <add>, %65, %cst_33 [1] : vector<8x5xf32> to vector<8xf32>
    %67 = vector.shape_cast %66 : vector<8xf32> to vector<8x1xf32>
    %68 = vector.broadcast %67 : vector<8x1xf32> to vector<8x5xf32>
    %69 = arith.divf %65, %68 : vector<8x5xf32>
    %c0_34 = arith.constant 0 : index
    %c0_35 = arith.constant 0 : index
    %70 = vector.load %arg8[%c0_34, %c0_35] : memref<8x5xf32, #tpu.memory_space<vmem>>, vector<8x5xf32>
    tpu.vector_store %arg8[%c0_34, %c0_35], %69 {strides = array<i32>} : memref<8x5xf32, #tpu.memory_space<vmem>>, vector<8x5xf32>,
    return
  }
  func.func @transform_0(%arg0: i32) -> (i32, i32) {
    %c0_i32 = arith.constant 0 : i32
    %c0_i32_0 = arith.constant 0 : i32
    %c0_i32_1 = arith.constant 0 : i32
    return %c0_i32, %c0_i32_0 : i32, i32
  }
  func.func @transform_1(%arg0: i32) -> (i32, i32) {
    %c0_i32 = arith.constant 0 : i32
    %c0_i32_0 = arith.constant 0 : i32
    %c0_i32_1 = arith.constant 0 : i32
    return %c0_i32, %c0_i32_0 : i32, i32
  }
  func.func @transform_2(%arg0: i32) -> (i32, i32) {
    %c0_i32 = arith.constant 0 : i32
    %c0_i32_0 = arith.constant 0 : i32
    %c0_i32_1 = arith.constant 0 : i32
    return %c0_i32, %c0_i32_0 : i32, i32
  }
  func.func @transform_3(%arg0: i32) -> (i32, i32) {
    %c0_i32 = arith.constant 0 : i32
    %c0_i32_0 = arith.constant 0 : i32
    %c0_i32_1 = arith.constant 0 : i32
    return %c0_i32, %c0_i32_0 : i32, i32
  }
  func.func @transform_4(%arg0: i32) -> (i32, i32) {
    %c0_i32 = arith.constant 0 : i32
    %c0_i32_0 = arith.constant 0 : i32
    %c0_i32_1 = arith.constant 0 : i32
    return %c0_i32, %c0_i32_0 : i32, i32
  }
  func.func @transform_5(%arg0: i32) -> (i32, i32) {
    %c0_i32 = arith.constant 0 : i32
    %c0_i32_0 = arith.constant 0 : i32
    %c0_i32_1 = arith.constant 0 : i32
    return %c0_i32, %c0_i32_0 : i32, i32
  }
  func.func @transform_6(%arg0: i32) -> (i32, i32) {
    %c0_i32 = arith.constant 0 : i32
    %c0_i32_0 = arith.constant 0 : i32
    %c0_i32_1 = arith.constant 0 : i32
    return %c0_i32, %c0_i32_0 : i32, i32
  }
  func.func @transform_7(%arg0: i32) -> (i32, i32) {
    %c0_i32 = arith.constant 0 : i32
    %c0_i32_0 = arith.constant 0 : i32
    %c0_i32_1 = arith.constant 0 : i32
    return %c0_i32, %c0_i32_0 : i32, i32
  }
}

</mosaic_0001>

<bundles_post_ra>
// kernel: tpu_custom_call.1
= control target key start
LH: loop header
LB: loop body
LE: loop exit
PB: predicated region body
PF: predicated region fallthrough
CT: control target
= control target key end

     0   :  { %v756_v7 = vmov 0.0|0.0   ;;  %vm757_vm0 = vmmov 0   ;;  %v758_v13 = vmov 0.0   ;;  %vm72_vm1 = vcmask 1043456   ;;  %s1010_s0 = inlined_call_operand.vmem [shape: f32[8,6], index: 0, kind: input, shape index: {}]   ;;  %s1011_s1 = inlined_call_operand.vmem [shape: f32[8,300], index: 1, kind: input, shape index: {}]   ;;  %s1012_s2 = inlined_call_operand.vmem [shape: f32[300,64], index: 2, kind: input, shape index: {}]   ;;  %s1013_s3 = inlined_call_operand.vmem [shape: f32[2,64], index: 3, kind: input, shape index: {}]   ;;  %s1014_s4 = inlined_call_operand.vmem [shape: f32[64,6], index: 4, kind: input, shape index: {}]   ;;  %s1015_s5 = inlined_call_operand.vmem [shape: f32[2,6], index: 5, kind: input, shape index: {}]   ;;  %s1016_s6 = inlined_call_operand.vmem [shape: f32[12,5], index: 6, kind: input, shape index: {}]   ;;  %s1017_s7 = inlined_call_operand.hbm [shape: f32[8,5], index: 7, kind: output, shape index: {}]  }
   0x1   :  { %v46_v0 = vld [vmem:[%s1012_s2 + $0x80] sm:$0xff]  ;;  %v47_v1 = vld [vmem:[%s1012_s2 + $0x88] sm:$0xff]  ;;  %v48_v5 = vld [vmem:[%s1012_s2 + $0x90] sm:$0xff]  ;;  %695 = vmatprep.subr.bf16.mxu1 %v756_v7  ;;  %631 = vmatprep.mubr.msk.f32.mxu1 %vm757_vm0, %v758_v13 }
   0x2   :  { %v30_v2 = vld [vmem:[%s1012_s2] sm:$0xff]  ;;  %v663_v3 = vpack.c.bf16 %v47_v1, %v46_v0  ;;  %v31_v4 = vld [vmem:[%s1012_s2 + $0x8] sm:$0xff]  ;;  %v49_v6 = vld [vmem:[%s1012_s2 + $0x98] sm:$0xff] }
   0x3   :  { %v665_v8 = vpack.c.bf16 %v31_v4, %v30_v2  ;;  %v667_v9 = vpack.c.bf16 %v49_v6, %v48_v5  ;;  %v32_v10 = vld [vmem:[%s1012_s2 + $0x10] sm:$0xff]  ;;  %v33_v11 = vld [vmem:[%s1012_s2 + $0x18] sm:$0xff]  ;;  %v50_v12 = vld [vmem:[%s1012_s2 + $0xa0] sm:$0xff] }
   0x4   :  { %664 = vmatprep.subr.bf16.mxu0 %v663_v3  ;;  %v51_v14 = vld [vmem:[%s1012_s2 + $0xa8] sm:$0xff]  ;;  %v669_v15 = vpack.c.bf16 %v33_v11, %v32_v10  ;;  %v34_v17 = vld [vmem:[%s1012_s2 + $0x20] sm:$0xff]  ;;  %v52_v19 = vld [vmem:[%s1012_s2 + $0xb0] sm:$0xff] }
   0x5   :  { %666 = vmatpush3.bf16.msra.mxu0 %v665_v8  ;;  %v671_v16 = vpack.c.bf16 %v51_v14, %v50_v12  ;;  %v35_v18 = vld [vmem:[%s1012_s2 + $0x28] sm:$0xff]  ;;  %v53_v20 = vld [vmem:[%s1012_s2 + $0xb8] sm:$0xff]  ;;  %v62_v22 = vld [vmem:[%s1012_s2 + $0x100] sm:$0xff] }
   0x6   :  { %668 = vmatprep.subr.bf16.mxu0 %v667_v9  ;;  %v673_v21 = vpack.c.bf16 %v35_v18, %v34_v17  ;;  %v63_v23 = vld [vmem:[%s1012_s2 + $0x108] sm:$0xff]  ;;  %v675_v24 = vpack.c.bf16 %v53_v20, %v52_v19  ;;  %v36_v25 = vld [vmem:[%s1012_s2 + $0x30] sm:$0xff]  ;;  %v37_v26 = vld [vmem:[%s1012_s2 + $0x38] sm:$0xff] }
   0x7   :  { %v54_v27 = vld [vmem:[%s1012_s2 + $0xc0] sm:$0xff]  ;;  %v696_v28 = vpack.c.bf16 %v63_v23, %v62_v22  ;;  %v55_v29 = vld [vmem:[%s1012_s2 + $0xc8] sm:$0xff]  ;;  %v64_v30 = vld [vmem:[%s1012_s2 + $0x110] sm:$0xff]  ;;  %v677_v33 = vpack.c.bf16 %v37_v26, %v36_v25 }
   0x8   :  { %v65_v31 = vld [vmem:[%s1012_s2 + $0x118] sm:$0xff]  ;;  %v28_v34 = vld [vmem:[%s1011_s1 + $0x8] sm:$0xff]  ;;  %v66_v35 = vld [vmem:[%s1012_s2 + $0x120] sm:$0xff]  ;;  %v679_v37 = vpack.c.bf16 %v55_v29, %v54_v27 }
   0x9   :  { %670 = vmatpush3.bf16.msra.mxu0 %v669_v15  ;;  %697 = vmatpush3.bf16.msra.mxu1 %v696_v28  ;;  %v699_v32 = vpack.c.bf16 %v65_v31, %v64_v30  ;;  %v67_v36 = vld [vmem:[%s1012_s2 + $0x128] sm:$0xf]  ;;  %v38_v38 = vld [vmem:[%s1012_s2 + $0x40] sm:$0xff]  ;;  %v56_v40 = vld [vmem:[%s1012_s2 + $0xd0] sm:$0xff] }
   0xa   :  { %672 = vmatprep.subr.bf16.mxu0 %v671_v16  ;;  %698 = vmatprep.subr.bf16.mxu1 %v756_v7  ;;  %v39_v39 = vld [vmem:[%s1012_s2 + $0x48] sm:$0xff]  ;;  %v57_v41 = vld [vmem:[%s1012_s2 + $0xd8] sm:$0xff] }
   0xb   :  { %140 = vmatprep.mubr.f32.mxu0 %v28_v34 }
   0xd   :  { %674 = vmatpush3.bf16.msra.mxu0 %v673_v21 }
   0xe   :  { %676 = vmatprep.subr.bf16.mxu0 %v675_v24 }
   0xf   :  { %12 = vsyncpa [#allocation3], 0  ;;  %700 = vmatpush3.bf16.msra.mxu1 %v699_v32  ;;  %v702_v42 = vpack.c.bf16 %v67_v36, %v66_v35  ;;  %v681_v43 = vpack.c.bf16 %v39_v39, %v38_v38  ;;  %vm759_vm2 = vmmov 1   ;;  %v683_v44 = vpack.c.bf16 %v57_v41, %v56_v40  ;;  %v40_v45 = vld [vmem:[%s1012_s2 + $0x50] sm:$0xff]  ;;  %v41_v46 = vld [vmem:[%s1012_s2 + $0x58] sm:$0xff] }
  0x10   :  { %701 = vmatprep.subr.bf16.mxu1 %v756_v7  ;;  %vm703_vm3 = vmpackc.low %vm72_vm1, %vm759_vm2  ;;  %v58_v47 = vld [vmem:[%s1012_s2 + $0xe0] sm:$0xff]  ;;  %v59_v48 = vld [vmem:[%s1012_s2 + $0xe8] sm:$0xff]  ;;  %vm68_vm4 = vcmask 359424   ;;  %v685_v50 = vpack.c.bf16 %v41_v46, %v40_v45  ;;  %vm216_vm5 = vcmask 523264   ;;  %vm380_vm6 = vcmask 1045504  }
  0x11   :  { %678 = vmatpush3.bf16.msra.mxu0 %v677_v33  ;;  %v29_v49 = vld [vmem:[%s1011_s1 + $0x10] sm:$0xff]  ;;  %v687_v51 = vpack.c.bf16 %v59_v48, %v58_v47  ;;  %v42_v52 = vld [vmem:[%s1012_s2 + $0x60] sm:$0xff]  ;;  %v43_v53 = vld [vmem:[%s1012_s2 + $0x68] sm:$0xff]  ;;  %vm336_vm7 = vcmask 48128   ;;  %vm530_vm8 = vcmask 39936  }
  0x12   :  { %680 = vmatprep.subr.bf16.mxu0 %v679_v37  ;;  %v60_v54 = vld [vmem:[%s1012_s2 + $0xf0] sm:$0xff]  ;;  %v61_v55 = vld [vmem:[%s1012_s2 + $0xf8] sm:$0xff]  ;;  %v689_v56 = vpack.c.bf16 %v43_v53, %v42_v52  ;;  %v27_v61 = vld [vmem:[%s1011_s1] sm:$0xff]  ;;  %v244_v37 = vlaneseq }
  0x13   :  { %704 = vmatpush3.bf16.msk.msra.mxu1 %vm703_vm3, %v702_v42  ;;  %v691_v57 = vpack.c.bf16 %v61_v55, %v60_v54  ;;  %v44_v58 = vld [vmem:[%s1012_s2 + $0x70] sm:$0xff]  ;;  %v45_v59 = vld [vmem:[%s1012_s2 + $0x78] sm:$0xff]  ;;  %v255_v62 = vld [vmem:[%s1014_s4] sm:$0xff] }
  0x14   :  { %705 = vmatprep.subr.bf16.mxu1 %v756_v7  ;;  %v693_v60 = vpack.c.bf16 %v45_v59, %v44_v58  ;;  %v256_v63 = vld [vmem:[%s1014_s4 + $0x8] sm:$0xff]  ;;  %v257_v1 = vld [vmem:[%s1014_s4 + $0x10] sm:$0xff]  ;;  %v258_v2 = vld [vmem:[%s1014_s4 + $0x18] sm:$0xff]  ;;  %v245_v38 = vshrl.u32 %v244_v37, 7 }
  0x15   :  { %682 = vmatpush3.bf16.msra.mxu0 %v681_v43  ;;  %v706_v0 = vpack.c.bf16 %v256_v63, %v255_v62  ;;  %v709_v3 = vpack.c.bf16 %v258_v2, %v257_v1  ;;  %v259_v4 = vld [vmem:[%s1014_s4 + $0x20] sm:$0xff]  ;;  %v260_v5 = vld [vmem:[%s1014_s4 + $0x28] sm:$0xff]  ;;  %v261_v8 = vld [vmem:[%s1014_s4 + $0x30] sm:$0xff] }
  0x16   :  { %684 = vmatprep.subr.bf16.mxu0 %v683_v44  ;;  %632 = vmatmul.mubr.msk.f32.vlgmr.msra.gmra.mrb[0].mxu1 %vm68_vm4, %v29_v49  ;;  %v712_v6 = vpack.c.bf16 %v260_v5, %v259_v4  ;;  %v262_v9 = vld [vmem:[%s1014_s4 + $0x38] sm:$0xff]  ;;  %v237_v39 = vld [vmem:[%s1013_s3] sm:$0x1]  ;;  %v246_v40 = vsub.s32 0, %v245_v38  ;;  %v241_v43 = vld [vmem:[%s1013_s3 + $0x1] sm:$0x1] }
  0x17   :  { %650 = vmatprep.mubr.msk.f32.mxu1 %vm757_vm0, %v758_v13  ;;  %707 = vmatpush3.bf16.msra.mxu1 %v706_v0  ;;  %v715_v10 = vpack.c.bf16 %v262_v9, %v261_v8 }
  0x18   :  { %708 = vmatprep.subr.bf16.mxu1 %v756_v7 }
  0x19   :  { %686 = vmatpush3.bf16.msra.mxu0 %v685_v50 }
  0x1a   :  { %688 = vmatprep.subr.bf16.mxu0 %v687_v51  ;;  %v376_v51 = vld [vmem:[%s1016_s6 + $0x6] sm:$0x3f] }
  0x1b   :  { %710 = vmatpush3.bf16.msra.mxu1 %v709_v3 }
  0x1c   :  { %711 = vmatprep.subr.bf16.mxu1 %v756_v7 }
  0x1d   :  { %690 = vmatpush3.bf16.msra.mxu0 %v689_v56 }
  0x1e   :  { %692 = vmatprep.subr.bf16.mxu0 %v691_v57 }
  0x1f   :  { %713 = vmatpush3.bf16.msra.mxu1 %v712_v6 }
  0x20   :  { %714 = vmatprep.subr.bf16.mxu1 %v756_v7 }
  0x21   :  { %694 = vmatpush3.bf16.msra.mxu0 %v693_v60 }
  0x23   :  { %716 = vmatpush3.bf16.msra.mxu1 %v715_v10 }
  0x24   :  { %141 = vmatmul.mubr.f32.vlgmr.msra.gmra.mrb[0].mxu0 %v27_v61  ;;  %653 = vmatprep.subr.mxu1 %v758_v13 }
  0xe9   :  { %v212_v11 = vpop.f32.mrb[0].mxu1 }
  0xea   :  { %v633_v12 = vpop.f32.mrb[1].mxu1 }
  0xf7   :  { %v596_v14 = vpop.f32.mrb[0].mxu0 }
  0xf8   :  { %v597_v15 = vpop.f32.mrb[1].mxu0 }
  0xf9   :  { %v598_v16 = vadd.f32 %v597_v15, %v596_v14  ;;  %v360_v15 = vld [vmem:[%s1015_s5 + $0x1] sm:$0x1] }
  0xfb   :  { %v213_v17 = vadd.f32 %v598_v16, %v212_v11  ;;  %v356_v11 = vld [vmem:[%s1015_s5] sm:$0x1] }
  0xfd   :  { %v217_v7 = vsel %vm216_vm5, %v213_v17, 0.0  ;;  %v226_v18 = vmul.f32 %v213_v17, %v213_v17 }
  0xfe   :  { %v218_v19 = vrot.slane %v217_v7, 4 }
  0xff   :  { %v227_v20 = vsel %vm216_vm5, %v226_v18, 0.0 }
 0x100   :  { %v219_v21 = vadd.f32 %v218_v19, %v217_v7  ;;  %v228_v22 = vrot.slane %v227_v20, 4 }
 0x102   :  { %v220_v23 = vrot.slane %v219_v21, 2  ;;  %v229_v24 = vadd.f32 %v228_v22, %v227_v20  ;;  %v375_v22 = vld [vmem:[%s1016_s6] sm:$0x3f]  ;;  %s760_s6 = smov [#allocation2]  }
 0x104   :  { %v221_v25 = vadd.f32 %v220_v23, %v219_v21  ;;  %v230_v26 = vrot.slane %v229_v24, 2  ;;  %v374_v23 = vld [vmem:[%s1010_s0] sm:$0xff]  ;;  %s549_s0 = sshll.u32 %s760_s6, 4  ;;  %s550_s0 = int_to_ptr.vmem [resolvable:$true] %s549_s0 }
 0x105   :  { %s732_s16 = scalar_lea.vmem %s550_s0, 128  ;;  %p737_p1 = scmp.lt.s32.totalorder %s550_s0, %s550_s0 }
 0x106   :  { %v222_v27 = vrot.slane %v221_v25, 1  ;;  %v231_v28 = vadd.f32 %v230_v26, %v229_v24  ;;  %p733_p0 = scmp.ne.s32.totalorder %s550_s0, %s732_s16  ;;  %p738_p2 = scmp.lt.s32.totalorder %s732_s16, %s732_s16 }
 0x108   :  { %v223_v29 = vadd.f32 %v222_v27, %v221_v25  ;;  %v232_v30 = vrot.slane %v231_v28, 1  ;;  %p739_p3 = por %p738_p2, %p737_p1 }
 0x10a   :  { %v225_v31 = vmul.f32 0.125, %v223_v29  ;;  %v233_v32 = vadd.f32 %v232_v30, %v231_v28  ;;  %p740_p4 = pnand %p739_p3, %p733_p0 }
 0x10c   :  { %v234_v33 = vmul.f32 0.125, %v233_v32  ;;  %v235_v34 = vmul.f32 %v225_v31, %v225_v31 }
 0x10e   :  { %v236_v35 = vsub.f32 %v234_v33, %v235_v34 }
 0x110   :  { %v238_v36 = vadd.f32 1e-05, %v236_v35 }
 0x112   :  { %724 = vrsqrt.f32 %v238_v36 }
 0x11c   :  { %v725_v41 = vpop.eup %724 }
 0x11d   :  { %v240_v42 = vmul.f32 %v725_v41, %v237_v39 }
 0x11f   :  { %v242_v44 = vmul.f32 %v240_v42, %v225_v31  ;;  %v247_v45 = vrot.slane %v240_v42, %v246_v40 }
 0x121   :  { %v243_v46 = vsub.f32 %v241_v43, %v242_v44  ;;  %v248_v47 = vmul.f32 %v247_v45, %v213_v17 }
 0x123   :  { %v252_v48 = vrot.slane %v243_v46, %v246_v40 }
 0x125   :  { %v253_v49 = vadd.f32 %v252_v48, %v248_v47 }
 0x127   :  { %v254_v50 = vmax.f32 %v253_v49, 0.0 }
 0x129   :  { %651 = vmatmul.mubr.msk.f32.vlgmr.msra.gmra.mrb[2].mxu1 %vm216_vm5, %v254_v50 }
 0x12a   :  { %655 = vmatprep.mubr.msk.f32.mxu1 %vm757_vm0, %v758_v13  ;;  %654 = vmatpush3.msk.msra.mxu1 %vm380_vm6, %v376_v51 }
 0x12b   :  { %658 = vmatprep.subr.mxu1 %v758_v13 }
 0x1fc   :  { %v332_v52 = vpop.f32.mrb[2].mxu1 }
 0x1fd   :  { %v337_v53 = vsel %vm336_vm7, %v332_v52, 0.0  ;;  %v345_v54 = vmul.f32 %v332_v52, %v332_v52  ;;  %v652_v55 = vpop.f32.mrb[3].mxu1 }
 0x1fe   :  { %v338_v56 = vrot.slane %v337_v53, 4 }
 0x1ff   :  { %v346_v57 = vsel %vm336_vm7, %v345_v54, 0.0 }
 0x200   :  { %v339_v58 = vadd.f32 %v338_v56, %v337_v53  ;;  %v347_v59 = vrot.slane %v346_v57, 4 }
 0x202   :  { %v340_v60 = vrot.slane %v339_v58, 2  ;;  %v348_v61 = vadd.f32 %v347_v59, %v346_v57 }
 0x204   :  { %v341_v62 = vadd.f32 %v340_v60, %v339_v58  ;;  %v349_v63 = vrot.slane %v348_v61, 2 }
 0x206   :  { %v342_v0 = vrot.slane %v341_v62, 1  ;;  %v350_v1 = vadd.f32 %v349_v63, %v348_v61 }
 0x208   :  { %v343_v2 = vadd.f32 %v342_v0, %v341_v62  ;;  %v351_v3 = vrot.slane %v350_v1, 1 }
 0x20a   :  { %v344_v4 = vmul.f32 0.125, %v343_v2  ;;  %v352_v5 = vadd.f32 %v351_v3, %v350_v1 }
 0x20c   :  { %v353_v6 = vmul.f32 0.125, %v352_v5  ;;  %v354_v8 = vmul.f32 %v344_v4, %v344_v4 }
 0x20e   :  { %v355_v9 = vsub.f32 %v353_v6, %v354_v8 }
 0x210   :  { %v357_v10 = vadd.f32 1e-05, %v355_v9 }
 0x212   :  { %726 = vrsqrt.f32 %v357_v10 }
 0x21c   :  { %v727_v12 = vpop.eup %726 }
 0x21d   :  { %v359_v14 = vmul.f32 %v727_v12, %v356_v11 }
 0x21f   :  { %v361_v16 = vmul.f32 %v359_v14, %v344_v4  ;;  %v366_v17 = vrot.slane %v359_v14, %v246_v40 }
 0x221   :  { %v362_v7 = vsub.f32 %v360_v15, %v361_v16  ;;  %v367_v18 = vmul.f32 %v366_v17, %v332_v52 }
 0x223   :  { %v371_v19 = vrot.slane %v362_v7, %v246_v40 }
 0x225   :  { %v372_v20 = vadd.f32 %v371_v19, %v367_v18 }
 0x227   :  { %v373_v21 = vmax.f32 %v372_v20, 0.0 }
 0x229   :  { %656 = vmatmul.mubr.msk.f32.vlgmr.msra.gmra.mrb[4].mxu1 %vm336_vm7, %v373_v21 }
 0x22a   :  { %659 = vmatpush3.msk.msra.mxu1 %vm380_vm6, %v375_v22  ;;  %660 = vmatprep.mubr.msk.f32.mxu1 %vm757_vm0, %v758_v13 }
 0x231   :  { %661 = vmatmul.mubr.msk.f32.vlgmr.msra.gmra.mrb[4].mxu1 %vm336_vm7, %v374_v23 }
 0x304   :  { %v526_v24 = vpop.f32.mrb[4].mxu1 }
 0x305   :  { %v662_v25 = vpop.f32.mrb[5].mxu1  ;;  %v531_v26 = vsel %vm530_vm8, %v526_v24, -inf }
 0x306   :  { %532 = vmax.xlane.f32.xlu0 %v531_v26 }
 0x393   :  { %v533_v27 = vpop.xlane.xlu0 %532 }
 0x394   :  { %v534_v28 = vsub.f32 %v526_v24, %v533_v27 }
 0x396   :  { %v535_v29 = vmul.f32 1.442695, %v534_v28 }
 0x398   :  { %728 = vpow2.f32 %v535_v29 }
 0x3a2   :  { %v729_v30 = vpop.eup %728 }
 0x3a3   :  { %v537_v31 = vsel %vm530_vm8, %v729_v30, 0.0 }
 0x3a4   :  { %538 = vadd.xlane.f32.xlu0 %v537_v31 }
 0x431   :  { %v539_v13 = vpop.xlane.xlu0 %538 }
 0x432   :  { %730 = vrcp.f32 %v539_v13 }
 0x43c   :  { %v731_v32 = vpop.eup %730 }
 0x43d   :  { %v541_v33 = vmul.f32 %v731_v32, %v729_v30 }
 0x43f   :  { %542 = vst.msk [vmem:[#allocation2] sm:$0xff] %vm530_vm8, %v541_v33 }
 0x440   :  { %743 = shalt.err (!%p740_p4)
}
 0x441   :  { %s744_s18 = scalar_lea.hbm %s1017_s7, 128 }
 0x442   :  { %p745_p5 = scmp.ne.s32.totalorder %s1017_s7, %s744_s18  ;;  %p748_p6 = scmp.lt.u32.totalorder %s744_s18, %s1017_s7 }
 0x444   :  { %p750_p7 = pnand %p748_p6, %p745_p5 }
 0x446   :  { %753 = shalt.err (!%p750_p7)
}
 0x447   :  { %552 = dma.vmem_to_hbm [thread:$0]  %s550_s0, 128, %s1017_s7, [#allocation3]  }
 0x448   :  { %754 = dma.done.wait [#allocation3], 128  }
 0x449   :  { %755 = vsyncadd [#allocation3], 4294967168 }
 0x44a   :  { %556 = vsyncpa [#allocation3], 1 }

</bundles_post_ra>
